<compile_context>
chip_gen: v7x
topology: tpu7x:2x2x1
jax: 0.10.0
libtpu: 0.0.40
codegen_flags: <defaults>
</compile_context>

<pallas_src>
import jax
import jax.numpy as jnp
from jax.experimental import pallas as pl
from jax.experimental.pallas import tpu as pltpu

H1 = 128   # linear1 out
H2 = 256   # linear2 out
BIAS_SLAB = 512  # 128 (b1) + 256 (b2) + 1 (b3), padded to a lane multiple


def _round_up(x, m):
    return ((x + m - 1) // m) * m


def critic_kernel(x_ref, w1_ref, w2_ref, w3_ref, b_ref, o_ref):
    """One batch tile: (TB, S) -> (TB, 1), weights VMEM-resident."""
    x = x_ref[...]
    b1 = b_ref[:, 0:H1]               # (1, 128)
    b2 = b_ref[:, H1:H1 + H2]         # (1, 256)
    b3 = b_ref[:, H1 + H2:H1 + H2 + 1]  # (1, 1)

    h1 = jnp.dot(x, w1_ref[...], preferred_element_type=jnp.float32) + b1
    h1 = jnp.maximum(h1, 0.0)
    h2 = jnp.dot(h1, w2_ref[...], preferred_element_type=jnp.float32) + b2
    h2 = jnp.maximum(h2, 0.0)
    # Final (256 -> 1) layer on VPU/XLU: broadcast-multiply by the w3 row and
    # reduce over lanes.  Keeps the N=1 GEMV off the MXU so it overlaps with
    # the MXU work of the next grid step.
    v = jnp.sum(h2 * w3_ref[...], axis=-1, keepdims=True) + b3
    o_ref[...] = v.astype(o_ref.dtype)


def critic_forward(state, params, tb_max=512):
    """state: (B, state_size) f32 -> value: (B, 1) f32."""
    w1, b1, w2, b2, w3, b3 = params
    B, S = state.shape
    assert w1.shape == (S, H1) and w2.shape == (H1, H2) and w3.shape == (H2, 1)

    # Batch tile: large enough to amortize per-step overhead, small enough to
    # keep live VMEM tiny (TB*(S + 128 + 256 + 1)*4 B).  512 rows measured
    # ~85% of HBM roofline; fits comfortably in the 32 MiB scoped default on
    # all of v5e/v6e/v7x.
    TB = min(tb_max, _round_up(B, 8))
    padded_B = _round_up(B, TB)
    if padded_B != B:
        state = jnp.pad(state, ((0, padded_B - B), (0, 0)))

    # Pack the three biases into one lane-aligned slab: one DMA instead of 3.
    bias_pack = jnp.zeros((1, BIAS_SLAB), jnp.float32)
    bias_pack = bias_pack.at[:, 0:H1].set(b1)
    bias_pack = bias_pack.at[:, H1:H1 + H2].set(b2)
    bias_pack = bias_pack.at[:, H1 + H2:H1 + H2 + 1].set(b3)
    # w3 is (256, 1); present it as a (1, 256) row for the VPU broadcast.
    w3_row = w3.reshape(1, H2)

    grid = (padded_B // TB,)
    cost = pl.CostEstimate(
        flops=2 * padded_B * (S * H1 + H1 * H2 + H2),
        transcendentals=0,
        bytes_accessed=4 * (padded_B * S + S * H1 + H1 * H2 + H2
                            + BIAS_SLAB + padded_B),
    )

    out = pl.pallas_call(
        critic_kernel,
        out_shape=jax.ShapeDtypeStruct((padded_B, 1), jnp.float32),
        grid=grid,
        in_specs=[
            # Batch-tiled activations.
            pl.BlockSpec((TB, S), lambda i: (i, 0)),
            # Weights / bias slab: constant index_map -> VMEM-resident.
            pl.BlockSpec((S, H1), lambda i: (0, 0)),
            pl.BlockSpec((H1, H2), lambda i: (0, 0)),
            pl.BlockSpec((1, H2), lambda i: (0, 0)),
            pl.BlockSpec((1, BIAS_SLAB), lambda i: (0, 0)),
        ],
        out_specs=pl.BlockSpec((TB, 1), lambda i: (i, 0)),
        compiler_params=pltpu.CompilerParams(
            dimension_semantics=("parallel",),
        ),
        cost_estimate=cost,
    )(state, w1, w2, w3_row, bias_pack)

    return out[:B]


def init_critic_params(key, state_size):
    """PyTorch nn.Linear default init: U[-1/sqrt(fan_in), 1/sqrt(fan_in)]."""
    def linear(k, fan_in, fan_out):
        kw, kb = jax.random.split(k)
        bound = 1.0 / jnp.sqrt(fan_in)
        w = jax.random.uniform(kw, (fan_in, fan_out), jnp.float32, -bound, bound)
        b = jax.random.uniform(kb, (1, fan_out), jnp.float32, -bound, bound)
        return w, b

    k1, k2, k3 = jax.random.split(key, 3)
    w1, b1 = linear(k1, state_size, H1)
    w2, b2 = linear(k2, H1, H2)
    w3, b3 = linear(k3, H2, 1)
    return (w1, b1, w2, b2, w3, b3)


def _reference(state, params):
    w1, b1, w2, b2, w3, b3 = params
    h = jnp.maximum(state @ w1 + b1, 0.0)
    h = jnp.maximum(h @ w2 + b2, 0.0)
    return h @ w3 + b3


if __name__ == "__main__":
    key = jax.random.PRNGKey(0)
    k_params, k_small, k_big = jax.random.split(key, 3)

    STATE_SIZE = 32  # synthetic env.observation_space.shape[0]
    params = init_critic_params(k_params, STATE_SIZE)

    # Small rollout-style batch (single-tile path).
    state_small = jax.random.normal(k_small, (8, STATE_SIZE), jnp.float32)
    v_small = jax.block_until_ready(critic_forward(state_small, params))
    ref_small = _reference(state_small, params)
    assert v_small.shape == (8, 1)
    assert jnp.allclose(v_small, ref_small, atol=1e-5, rtol=1e-5)

    # Larger batch to exercise the multi-tile grid + padding path.
    state_big = jax.random.normal(k_big, (1037, STATE_SIZE), jnp.float32)
    v_big = jax.block_until_ready(critic_forward(state_big, params))
    ref_big = _reference(state_big, params)
    assert v_big.shape == (1037, 1)
    assert jnp.allclose(v_big, ref_big, atol=1e-5, rtol=1e-5)

    print("KERNEL_OK")
</pallas_src>

<mosaic_0001>
module attributes {stable_mosaic.version = 11 : i64} {
  func.func @critic_kernel(%arg0: i32, %arg1: memref<8x32xf32, #tpu.memory_space<vmem>>, %arg2: memref<32x128xf32, #tpu.memory_space<vmem>>, %arg3: memref<128x256xf32, #tpu.memory_space<vmem>>, %arg4: memref<1x256xf32, #tpu.memory_space<vmem>>, %arg5: memref<1x512xf32, #tpu.memory_space<vmem>>, %arg6: memref<8x1xf32, #tpu.memory_space<vmem>>) attributes {dimension_semantics = [#tpu.dimension_semantics<parallel>], iteration_bounds = array<i64: 1>, scalar_prefetch = 0 : i64, scratch_operands = 0 : i64, tpu.core_type = #tpu.core_type<tc>, window_params = [{transform_indices = @transform_0, window_bounds = array<i64: 8, 32>}, {pipeline_mode = #tpu.pipeline_mode<synchronous>, transform_indices = @transform_1, window_bounds = array<i64: 32, 128>}, {pipeline_mode = #tpu.pipeline_mode<synchronous>, transform_indices = @transform_2, window_bounds = array<i64: 128, 256>}, {pipeline_mode = #tpu.pipeline_mode<synchronous>, transform_indices = @transform_3, window_bounds = array<i64: 1, 256>}, {pipeline_mode = #tpu.pipeline_mode<synchronous>, transform_indices = @transform_4, window_bounds = array<i64: 1, 512>}, {transform_indices = @transform_5, window_bounds = array<i64: 8, 1>}]} {
    %c0 = arith.constant 0 : index
    %c0_0 = arith.constant 0 : index
    %0 = vector.load %arg1[%c0, %c0_0] : memref<8x32xf32, #tpu.memory_space<vmem>>, vector<8x32xf32>
    %c0_1 = arith.constant 0 : index
    %c0_2 = arith.constant 0 : index
    %1 = vector.load %arg5[%c0_1, %c0_2] : memref<1x512xf32, #tpu.memory_space<vmem>>, vector<1x128xf32>
    %c0_3 = arith.constant 0 : index
    %c128 = arith.constant 128 : index
    %2 = vector.load %arg5[%c0_3, %c128] : memref<1x512xf32, #tpu.memory_space<vmem>>, vector<1x256xf32>
    %c0_4 = arith.constant 0 : index
    %c384 = arith.constant 384 : index
    %3 = vector.load %arg5[%c0_4, %c384] : memref<1x512xf32, #tpu.memory_space<vmem>>, vector<1x1xf32>
    %c0_5 = arith.constant 0 : index
    %c0_6 = arith.constant 0 : index
    %4 = vector.load %arg2[%c0_5, %c0_6] : memref<32x128xf32, #tpu.memory_space<vmem>>, vector<32x128xf32>
    %cst = arith.constant dense<0.000000e+00> : vector<8x128xf32>
    %5 = tpu.matmul %0, %4, %cst {dimension_numbers = #tpu.dot_dimension_numbers<[1], [0], [0], [1], [0, 0, 1, 1], [], []>} : vector<8x32xf32>, vector<32x128xf32>, vector<8x128xf32> -> vector<8x128xf32>
    %6 = vector.broadcast %1 : vector<1x128xf32> to vector<8x128xf32>
    %7 = arith.addf %5, %6 : vector<8x128xf32>
    %cst_7 = arith.constant 0.000000e+00 : f32
    %8 = vector.broadcast %cst_7 : f32 to vector<8x128xf32>
    %9 = arith.maximumf %7, %8 : vector<8x128xf32>
    %c0_8 = arith.constant 0 : index
    %c0_9 = arith.constant 0 : index
    %10 = vector.load %arg3[%c0_8, %c0_9] : memref<128x256xf32, #tpu.memory_space<vmem>>, vector<128x256xf32>
    %cst_10 = arith.constant dense<0.000000e+00> : vector<8x256xf32>
    %11 = tpu.matmul %9, %10, %cst_10 {dimension_numbers = #tpu.dot_dimension_numbers<[1], [0], [0], [1], [0, 0, 1, 1], [], []>} : vector<8x128xf32>, vector<128x256xf32>, vector<8x256xf32> -> vector<8x256xf32>
    %12 = vector.broadcast %2 : vector<1x256xf32> to vector<8x256xf32>
    %13 = arith.addf %11, %12 : vector<8x256xf32>
    %cst_11 = arith.constant 0.000000e+00 : f32
    %14 = vector.broadcast %cst_11 : f32 to vector<8x256xf32>
    %15 = arith.maximumf %13, %14 : vector<8x256xf32>
    %c0_12 = arith.constant 0 : index
    %c0_13 = arith.constant 0 : index
    %16 = vector.load %arg4[%c0_12, %c0_13] : memref<1x256xf32, #tpu.memory_space<vmem>>, vector<1x256xf32>
    %17 = vector.broadcast %16 : vector<1x256xf32> to vector<8x256xf32>
    %18 = arith.mulf %15, %17 : vector<8x256xf32>
    %cst_14 = arith.constant dense<0.000000e+00> : vector<8xf32>
    %19 = vector.multi_reduction <add>, %18, %cst_14 [1] : vector<8x256xf32> to vector<8xf32>
    %20 = vector.shape_cast %19 : vector<8xf32> to vector<8x1xf32>
    %21 = vector.broadcast %3 : vector<1x1xf32> to vector<8x1xf32>
    %22 = arith.addf %20, %21 : vector<8x1xf32>
    %c0_15 = arith.constant 0 : index
    %c0_16 = arith.constant 0 : index
    %23 = vector.load %arg6[%c0_15, %c0_16] : memref<8x1xf32, #tpu.memory_space<vmem>>, vector<8x1xf32>
    tpu.vector_store %arg6[%c0_15, %c0_16], %22 {strides = array<i32>} : memref<8x1xf32, #tpu.memory_space<vmem>>, vector<8x1xf32>,
    return
  }
  func.func @transform_0(%arg0: i32) -> (i32, i32) {
    %c0_i32 = arith.constant 0 : i32
    %c0_i32_0 = arith.constant 0 : i32
    return %arg0, %c0_i32 : i32, i32
  }
  func.func @transform_1(%arg0: i32) -> (i32, i32) {
    %c0_i32 = arith.constant 0 : i32
    %c0_i32_0 = arith.constant 0 : i32
    %c0_i32_1 = arith.constant 0 : i32
    return %c0_i32, %c0_i32_0 : i32, i32
  }
  func.func @transform_2(%arg0: i32) -> (i32, i32) {
    %c0_i32 = arith.constant 0 : i32
    %c0_i32_0 = arith.constant 0 : i32
    %c0_i32_1 = arith.constant 0 : i32
    return %c0_i32, %c0_i32_0 : i32, i32
  }
  func.func @transform_3(%arg0: i32) -> (i32, i32) {
    %c0_i32 = arith.constant 0 : i32
    %c0_i32_0 = arith.constant 0 : i32
    %c0_i32_1 = arith.constant 0 : i32
    return %c0_i32, %c0_i32_0 : i32, i32
  }
  func.func @transform_4(%arg0: i32) -> (i32, i32) {
    %c0_i32 = arith.constant 0 : i32
    %c0_i32_0 = arith.constant 0 : i32
    %c0_i32_1 = arith.constant 0 : i32
    return %c0_i32, %c0_i32_0 : i32, i32
  }
  func.func @transform_5(%arg0: i32) -> (i32, i32) {
    %c0_i32 = arith.constant 0 : i32
    %c0_i32_0 = arith.constant 0 : i32
    return %arg0, %c0_i32 : i32, i32
  }
}

</mosaic_0001>

<bundles_post_ra>
// kernel: tpu_custom_call.1
= control target key start
LH: loop header
LB: loop body
LE: loop exit
PB: predicated region body
PF: predicated region fallthrough
CT: control target
= control target key end

     0   :  { %10 = vsyncpa [#allocation3], 0  ;;  %s524_s0 = inlined_call_operand.hbm [shape: f32[8,32], index: 0, kind: input, shape index: {}]   ;;  %s525_s1 = inlined_call_operand.hbm [shape: f32[32,128], index: 1, kind: input, shape index: {}]   ;;  %s526_s2 = inlined_call_operand.hbm [shape: f32[128,256], index: 2, kind: input, shape index: {}]   ;;  %s527_s3 = inlined_call_operand.vmem [shape: f32[1,256], index: 3, kind: input, shape index: {}]   ;;  %s528_s4 = inlined_call_operand.vmem [shape: f32[1,512], index: 4, kind: input, shape index: {}]   ;;  %s529_s5 = inlined_call_operand.vmem [shape: f32[8,1], index: 5, kind: output, shape index: {}]  }
   0x1   :  { %11 = vsyncpa [#allocation5], 0  ;;  %s433_s18 = smov [#allocation4]   ;;  %s363_s22 = scalar_lea.hbm %s525_s1, 512 }
   0x2   :  { %s27_s19 = sshll.u32 %s433_s18, 4  ;;  %p364_p0 = scmp.ne.s32.totalorder %s525_s1, %s363_s22  ;;  %s28_s19 = int_to_ptr.vmem [resolvable:$true] %s27_s19 }
   0x3   :  { %p367_p1 = scmp.lt.u32.totalorder %s363_s22, %s525_s1 }
   0x5   :  { %p369_p2 = pnand %p367_p1, %p364_p0 }
   0x7   :  { %372 = shalt.err (!%p369_p2)
}
   0x8   :  { %s373_s27 = scalar_lea.vmem %s28_s19, 512  ;;  %p378_p4 = scmp.lt.s32.totalorder %s28_s19, %s28_s19 }
   0x9   :  { %p374_p3 = scmp.ne.s32.totalorder %s28_s19, %s373_s27  ;;  %p379_p5 = scmp.lt.s32.totalorder %s373_s27, %s373_s27 }
   0xb   :  { %p380_p6 = por %p379_p5, %p378_p4 }
   0xd   :  { %p381_p7 = pnand %p380_p6, %p374_p3 }
   0xf   :  { %384 = shalt.err (!%p381_p7)
}
  0x10   :  { %s434_s28 = smov 128   ;;  %s435_s29 = smov 8  }
  0x11   :  { %33 = dma.hbm_to_vmem [thread:$0]  %s525_s1, 512, %s28_s19, [#allocation5], %s434_s28, %s434_s28, %s435_s29  }
  0x12   :  { %s436_s7 = smov [#allocation2]   ;;  %s437_s9 = smov [#allocation6]  }
  0x13   :  { %s18_s8 = sshll.u32 %s436_s7, 4  ;;  %s39_s10 = sshll.u32 %s437_s9, 4  ;;  %s19_s8 = int_to_ptr.vmem [resolvable:$true] %s18_s8  ;;  %s40_s10 = int_to_ptr.vmem [resolvable:$true] %s39_s10 }
  0x14   :  { %s385_s13 = scalar_lea.hbm %s524_s0, 128 }
  0x15   :  { %p386_p8 = scmp.ne.s32.totalorder %s524_s0, %s385_s13  ;;  %p389_p9 = scmp.lt.u32.totalorder %s385_s13, %s524_s0 }
  0x17   :  { %p391_p10 = pnand %p389_p9, %p386_p8 }
  0x19   :  { %394 = shalt.err (!%p391_p10)
}
  0x1a   :  { %s395_s1 = scalar_lea.vmem %s19_s8, 128  ;;  %p400_p12 = scmp.lt.s32.totalorder %s19_s8, %s19_s8 }
  0x1b   :  { %p396_p11 = scmp.ne.s32.totalorder %s19_s8, %s395_s1  ;;  %p401_p13 = scmp.lt.s32.totalorder %s395_s1, %s395_s1 }
  0x1d   :  { %p402_p0 = por %p401_p13, %p400_p12 }
  0x1f   :  { %p403_p1 = pnand %p402_p0, %p396_p11 }
  0x21   :  { %406 = shalt.err (!%p403_p1)
}
  0x22   :  { %21 = dma.hbm_to_vmem [thread:$0]  %s524_s0, 128, %s19_s8, [#allocation3]  }
  0x23   :  { %s407_s22 = scalar_lea.hbm %s526_s2, 4096 }
  0x24   :  { %p408_p2 = scmp.ne.s32.totalorder %s526_s2, %s407_s22  ;;  %p411_p3 = scmp.lt.u32.totalorder %s407_s22, %s526_s2 }
  0x26   :  { %p413_p4 = pnand %p411_p3, %p408_p2 }
  0x28   :  { %416 = shalt.err (!%p413_p4)
}
  0x29   :  { %s417_s27 = scalar_lea.vmem %s40_s10, 4096  ;;  %p422_p6 = scmp.lt.s32.totalorder %s40_s10, %s40_s10 }
  0x2a   :  { %p418_p5 = scmp.ne.s32.totalorder %s40_s10, %s417_s27  ;;  %p423_p7 = scmp.lt.s32.totalorder %s417_s27, %s417_s27 }
  0x2c   :  { %p424_p8 = por %p423_p7, %p422_p6 }
  0x2e   :  { %p425_p9 = pnand %p424_p8, %p418_p5 }
  0x30   :  { %428 = shalt.err (!%p425_p9)
}
  0x31   :  { %s438_s0 = smov 256   ;;  %s439_s28 = smov 16  }
  0x32   :  { %45 = dma.hbm_to_vmem [thread:$0]  %s526_s2, 4096, %s40_s10, [#allocation5], %s438_s0, %s438_s0, %s439_s28  }
  0x33   :  { %429 = dma.done.wait [#allocation3], 128  }
  0x34   :  { %430 = vsyncadd [#allocation3], 4294967168 }
  0x35   :  { %431 = dma.done.wait [#allocation5], 4608  }
  0x36   :  { %432 = vsyncadd [#allocation5], 4294962688  ;;  %v440_v0 = vmov 0.0|0.0   ;;  %vm441_vm0 = vmmov 0   ;;  %v442_v1 = vmov 0.0   ;;  %v63_v2 = vld [vmem:[#allocation4] sm:$0xff]  ;;  %v181_v62 = vlaneseq }
  0x37   :  { %315 = vmatprep.subr.bf16.mxu0 %v440_v0  ;;  %312 = vmatprep.mubr.msk.f32.mxu0 %vm441_vm0, %v442_v1  ;;  %v64_v3 = vld [vmem:[#allocation4 + $0x8] sm:$0xff]  ;;  %v65_v4 = vld [vmem:[#allocation4 + $0x10] sm:$0xff]  ;;  %v66_v6 = vld [vmem:[#allocation4 + $0x18] sm:$0xff]  ;;  %vm73_vm1 = vcmask 261120   ;;  %vm288_vm2 = vcmask 7168  }
  0x38   :  { %255 = vmatprep.mubr.f32.mxu1 %v442_v1  ;;  %v316_v5 = vpack.c.bf16 %v64_v3, %v63_v2  ;;  %v149_v7 = vld [vmem:[#allocation6 + $0x8] sm:$0xff]  ;;  %v151_v8 = vld [vmem:[#allocation6 + $0x18] sm:$0xff]  ;;  %v148_v9 = vld [vmem:[#allocation6] sm:$0xff]  ;;  %v319_v11 = vpack.c.bf16 %v66_v6, %v65_v4  ;;  %v182_v63 = vshrl.u32 %v181_v62, 7 }
  0x39   :  { %v150_v10 = vld [vmem:[#allocation6 + $0x10] sm:$0xff]  ;;  %v321_v12 = vpack.c.bf16 %v151_v8, %v149_v7  ;;  %v153_v14 = vld [vmem:[#allocation6 + $0x28] sm:$0xff]  ;;  %v155_v15 = vld [vmem:[#allocation6 + $0x38] sm:$0xff] }
  0x3a   :  { %317 = vmatpush3.bf16.msra.mxu0 %v316_v5  ;;  %v323_v13 = vpack.c.bf16 %v150_v10, %v148_v9  ;;  %v152_v16 = vld [vmem:[#allocation6 + $0x20] sm:$0xff]  ;;  %v325_v17 = vpack.c.bf16 %v155_v15, %v153_v14  ;;  %v154_v18 = vld [vmem:[#allocation6 + $0x30] sm:$0xff]  ;;  %v157_v19 = vld [vmem:[#allocation6 + $0x48] sm:$0xff]  ;;  %v187_v2 = vsub.s32 1, %v182_v63 }
  0x3b   :  { %318 = vmatprep.subr.bf16.mxu0 %v440_v0  ;;  %v159_v20 = vld [vmem:[#allocation6 + $0x58] sm:$0xff]  ;;  %322 = vmatprep.subr.bf16.mxu1 %v321_v12  ;;  %v327_v21 = vpack.c.bf16 %v154_v18, %v152_v16  ;;  %v156_v24 = vld [vmem:[#allocation6 + $0x40] sm:$0xff]  ;;  %v158_v25 = vld [vmem:[#allocation6 + $0x50] sm:$0xff]  ;;  %v183_v0 = vsub.s32 0, %v182_v63 }
  0x3c   :  { %324 = vmatpush1.bf16.msra.mxu1 %v323_v13  ;;  %v59_v22 = vld [vmem:[#allocation2] sm:$0xff]  ;;  %v329_v23 = vpack.c.bf16 %v159_v20, %v157_v19  ;;  %v161_v26 = vld [vmem:[#allocation6 + $0x68] sm:$0xff]  ;;  %v331_v28 = vpack.c.bf16 %v158_v25, %v156_v24  ;;  %v160_v30 = vld [vmem:[#allocation6 + $0x60] sm:$0xff] }
  0x3d   :  { %326 = vmatprep.subr.bf16.mxu1 %v325_v17  ;;  %v163_v27 = vld [vmem:[#allocation6 + $0x78] sm:$0xff]  ;;  %v162_v31 = vld [vmem:[#allocation6 + $0x70] sm:$0xff]  ;;  %v165_v32 = vld [vmem:[#allocation6 + $0x88] sm:$0xff] }
  0x3e   :  { %320 = vmatpush3.bf16.msra.mxu0 %v319_v11  ;;  %v333_v29 = vpack.c.bf16 %v163_v27, %v161_v26  ;;  %v167_v33 = vld [vmem:[#allocation6 + $0x98] sm:$0xff]  ;;  %v335_v34 = vpack.c.bf16 %v162_v31, %v160_v30  ;;  %v164_v36 = vld [vmem:[#allocation6 + $0x80] sm:$0xff]  ;;  %v166_v37 = vld [vmem:[#allocation6 + $0x90] sm:$0xff] }
  0x3f   :  { %v337_v35 = vpack.c.bf16 %v167_v33, %v165_v32  ;;  %v169_v38 = vld [vmem:[#allocation6 + $0xa8] sm:$0xff]  ;;  %v171_v39 = vld [vmem:[#allocation6 + $0xb8] sm:$0xff]  ;;  %v339_v40 = vpack.c.bf16 %v166_v37, %v164_v36  ;;  %v168_v42 = vld [vmem:[#allocation6 + $0xa0] sm:$0xff] }
  0x40   :  { %328 = vmatpush1.bf16.msra.mxu1 %v327_v21  ;;  %v341_v41 = vpack.c.bf16 %v171_v39, %v169_v38  ;;  %v170_v43 = vld [vmem:[#allocation6 + $0xb0] sm:$0xff]  ;;  %v173_v44 = vld [vmem:[#allocation6 + $0xc8] sm:$0xff]  ;;  %v175_v45 = vld [vmem:[#allocation6 + $0xd8] sm:$0xff] }
  0x41   :  { %313 = vmatmul.mubr.msk.f32.vlgmr.msra.gmra.mrb[0].mxu0 %vm73_vm1, %v59_v22  ;;  %330 = vmatprep.subr.bf16.mxu1 %v329_v23  ;;  %v343_v46 = vpack.c.bf16 %v170_v43, %v168_v42  ;;  %v345_v47 = vpack.c.bf16 %v175_v45, %v173_v44  ;;  %v172_v48 = vld [vmem:[#allocation6 + $0xc0] sm:$0xff]  ;;  %v174_v49 = vld [vmem:[#allocation6 + $0xd0] sm:$0xff]  ;;  %v177_v51 = vld [vmem:[#allocation6 + $0xe8] sm:$0xff] }
  0x42   :  { %v347_v50 = vpack.c.bf16 %v174_v49, %v172_v48  ;;  %v179_v52 = vld [vmem:[#allocation6 + $0xf8] sm:$0xff]  ;;  %v176_v54 = vld [vmem:[#allocation6 + $0xe0] sm:$0xff]  ;;  %v178_v55 = vld [vmem:[#allocation6 + $0xf0] sm:$0xff] }
  0x43   :  { %v349_v53 = vpack.c.bf16 %v179_v52, %v177_v51  ;;  %v351_v56 = vpack.c.bf16 %v178_v55, %v176_v54  ;;  %v296_v57 = vld [vmem:[%s528_s4] ss:$0 sm:$0xff]  ;;  %v61_v1 = vld [vmem:[%s528_s4 + $0x1] sm:$0x3]  ;;  %v298_v17 = vld [vmem:[%s528_s4 + $0x3] ss:$0 sm:$0xff] }
  0x44   :  { %332 = vmatpush1.bf16.msra.mxu1 %v331_v28  ;;  %v184_v3 = vrot.slane %v61_v1, %v183_v0  ;;  %v188_v4 = vrot.slane %v61_v1, %v187_v2  ;;  %v264_v5 = vld [vmem:[%s527_s3] sm:$0x3] }
  0x45   :  { %334 = vmatprep.subr.bf16.mxu1 %v333_v29  ;;  %v269_v9 = vrot.slane %v264_v5, %v183_v0  ;;  %v273_v11 = vrot.slane %v264_v5, %v187_v2 }
  0x48   :  { %336 = vmatpush1.bf16.msra.mxu1 %v335_v34 }
  0x49   :  { %338 = vmatprep.subr.bf16.mxu1 %v337_v35 }
  0x4c   :  { %340 = vmatpush1.bf16.msra.mxu1 %v339_v40 }
  0x4d   :  { %342 = vmatprep.subr.bf16.mxu1 %v341_v41 }
  0x50   :  { %344 = vmatpush1.bf16.msra.mxu1 %v343_v46 }
  0x51   :  { %346 = vmatprep.subr.bf16.mxu1 %v345_v47 }
  0x54   :  { %348 = vmatpush1.bf16.msra.mxu1 %v347_v50 }
  0x55   :  { %350 = vmatprep.subr.bf16.mxu1 %v349_v53 }
  0x58   :  { %352 = vmatpush1.bf16.msra.mxu1 %v351_v56 }
 0x114   :  { %v143_v58 = vpop.f32.mrb[0].mxu0 }
 0x115   :  { %v144_v59 = vadd.f32 %v296_v57, %v143_v58  ;;  %v314_v60 = vpop.f32.mrb[1].mxu0 }
 0x117   :  { %v147_v61 = vmax.f32 %v144_v59, 0.0 }
 0x119   :  { %256 = vmatmul.mubr.f32.vlgmr.msra.gmra.mrb[0].mxu1 %v147_v61 }
 0x1ec   :  { %v257_v6 = vpop.f32.mrb[0].mxu1 }
 0x1ed   :  { %v258_v7 = vadd.f32 %v257_v6, %v184_v3  ;;  %v259_v8 = vpop.f32.mrb[1].mxu1 }
 0x1ee   :  { %v260_v10 = vadd.f32 %v259_v8, %v188_v4 }
 0x1ef   :  { %v262_v12 = vmax.f32 %v258_v7, 0.0 }
 0x1f0   :  { %v263_v13 = vmax.f32 %v260_v10, 0.0 }
 0x1f1   :  { %v276_v14 = vmul.f32 %v269_v9, %v262_v12 }
 0x1f2   :  { %v277_v15 = vmul.f32 %v273_v11, %v263_v13 }
 0x1f4   :  { %v278_v16 = vadd.f32 %v277_v15, %v276_v14 }
 0x1f6   :  { %279 = vadd.xlane.f32.xlu0 %v278_v16 }
 0x283   :  { %v280_v18 = vpop.xlane.xlu0 %279 }
 0x284   :  { %v287_v19 = vadd.f32 %v298_v17, %v280_v18 }
 0x286   :  { %289 = vst.msk [vmem:[%s529_s5] sm:$0xff] %vm288_vm2, %v287_v19 }
 0x287   :  { %294 = vsyncpa [#allocation3], 1 }
 0x288   :  { %295 = vsyncpa [#allocation5], 1 }

</bundles_post_ra>
